<compile_context>
chip_gen: v6e
topology: v6e:2x2x1
jax: 0.10.0
libtpu: 0.0.40
codegen_flags: <defaults>
</compile_context>

<pallas_src>
import functools

import numpy as np
import jax
import jax.numpy as jnp
from jax import lax
from jax.experimental import pallas as pl
from jax.experimental.pallas import tpu as pltpu

N_QUBITS = 6
_LANE = 128


def quantum_layer_kernel(x_ref, cw_ref, o_ref, *, n_qubits):
    # x_ref : (n_sub, tb)  raw inputs, qubit i on sublane i (rows >= n_qubits are 0)
    # cw_ref: (n_sub, 1)   cos(weights), rows >= n_qubits are 1
    # o_ref : (n_qubits, tb)  row k = P(final bit of qubit k == 1)
    q = cw_ref[...] * jnp.cos(x_ref[...] * (2.0 * jnp.pi))      # (n_sub, tb)
    # rows >= n_qubits hold q == 1 (identity for the products below)
    row = lax.broadcasted_iota(jnp.int32, q.shape, 0)

    # Inclusive prefix-product scan along the qubit (sublane) axis:
    # ~log2(n) full-width multiplies; the shifts run on the XLU.
    p = q
    s = 1
    while s < n_qubits:
        shifted = pltpu.roll(p, shift=s, axis=0)     # shifted[i] = p[(i - s) % n_sub]
        p = p * jnp.where(row >= s, shifted, 1.0)    # wrapped rows masked to identity
        s *= 2
    # p[k, :] = q_0 * ... * q_k   == parity product of final bit k (k >= 1)

    # tail = q_1 * ... * q_{n-1}  == parity product of final bit 0
    tail = q[1:2, :]
    for i in range(2, n_qubits):
        tail = tail * q[i:i + 1, :]

    par = jnp.where(row == 0, jnp.broadcast_to(tail, q.shape), p)
    out = 0.5 * (1.0 - par[:n_qubits, :])
    o_ref[...] = out                                  # single full-tile store


@functools.partial(jax.jit, static_argnames=("n_qubits", "batch_tile"))
def quantum_layer_forward(x, weights, n_qubits=N_QUBITS, batch_tile=65536):
    if n_qubits < 2:
        raise ValueError("quantum_layer_forward requires n_qubits >= 2")
    batch = x.shape[0]
    n_sub = ((n_qubits + 7) // 8) * 8        # pad qubit axis to a full sublane group

    # ---- choose a lane-aligned batch tile -----------------------------------
    # Big tiles amortize per-grid-step overhead; at least two tiles (when the
    # batch allows) so the "parallel" axis shards across both TCs on v7x.
    if batch <= _LANE:
        tb = batch                                           # single full-extent block
    else:
        cap = max(_LANE, (min(batch_tile, 131072) // _LANE) * _LANE)
        half = (((batch + 1) // 2) + _LANE - 1) // _LANE * _LANE
        tb = min(cap, half)
    n_tiles = pl.cdiv(batch, tb)
    padded = n_tiles * tb

    # Kernel-side layout: (n_sub, padded), batch on lanes.  Rows >= n_qubits
    # are zero (-> q = 1, identity).  Padded batch columns are zero; their
    # outputs are garbage and sliced off below — never read them.
    x_t = jnp.transpose(x[:, :n_qubits].astype(jnp.float32))            # (n, B)
    x_t = jnp.pad(x_t, ((0, n_sub - n_qubits), (0, padded - batch)))
    # Precompute cos(weights); padded rows get 1.0 (multiplicative identity).
    cw = jnp.pad(jnp.cos(weights.astype(jnp.float32)).reshape(n_qubits, 1),
                 ((0, n_sub - n_qubits), (0, 0)), constant_values=1.0)

    kernel = functools.partial(quantum_layer_kernel, n_qubits=n_qubits)
    out_t = pl.pallas_call(
        kernel,
        out_shape=jax.ShapeDtypeStruct((n_qubits, padded), jnp.float32),
        grid=(n_tiles,),
        in_specs=[
            pl.BlockSpec((n_sub, tb), lambda i: (0, i)),
            pl.BlockSpec((n_sub, 1), lambda i: (0, 0)),
        ],
        out_specs=pl.BlockSpec((n_qubits, tb), lambda i: (0, i)),
        compiler_params=pltpu.CompilerParams(
            dimension_semantics=("parallel",),
            vmem_limit_bytes=32 * 1024 * 1024),
    )(x_t, cw)

    # Row k of out_t is qubit k; module output column j reads bitstring char j
    # == qubit n-1-j, so reverse the (tiny) qubit axis while transposing back.
    return jnp.transpose(out_t[:, :batch])[:, ::-1]


def _reference_numpy(x, weights, n_qubits):
    """Brute-force 2^n reference (exact-expectation version of the module)."""
    x = np.asarray(x, np.float64)
    w = np.asarray(weights, np.float64)
    theta = x[:, :n_qubits] * 2.0 * np.pi
    p1 = (np.sin(w / 2) ** 2) * (np.cos(theta / 2) ** 2) \
        + (np.cos(w / 2) ** 2) * (np.sin(theta / 2) ** 2)             # (B, n)
    batch = x.shape[0]
    feats = np.zeros((batch, n_qubits))
    for b in range(batch):
        for s in range(1 << n_qubits):
            bits = [(s >> i) & 1 for i in range(n_qubits)]
            p = 1.0
            for i in range(n_qubits):
                p *= p1[b, i] if bits[i] else (1.0 - p1[b, i])
            fb = list(bits)
            for i in range(n_qubits):                                  # cx(i, (i+1)%n)
                fb[(i + 1) % n_qubits] ^= fb[i]
            for j in range(n_qubits):                                  # char j = qubit n-1-j
                feats[b, j] += p * fb[n_qubits - 1 - j]
    return feats


if __name__ == "__main__":
    key = jax.random.PRNGKey(0)
    kx, kw, kx2 = jax.random.split(key, 3)

    batch = 8
    x = jax.random.uniform(kx, (batch, N_QUBITS), dtype=jnp.float32)
    weights = jax.random.uniform(kw, (N_QUBITS,), dtype=jnp.float32) * 2.0 * jnp.pi

    out = jax.block_until_ready(quantum_layer_forward(x, weights))
    assert out.shape == (batch, N_QUBITS)
    assert bool(jnp.all(jnp.isfinite(out)))
    assert bool(jnp.all(out >= -1e-5)) and bool(jnp.all(out <= 1.0 + 1e-5))

    ref = _reference_numpy(np.asarray(x), np.asarray(weights), N_QUBITS)
    assert np.allclose(np.asarray(out), ref, atol=1e-5), \
        f"max err {np.max(np.abs(np.asarray(out) - ref))}"

    # Exercise the multi-tile, padded paths (2 tiles of 256 vs 3 tiles of 128)
    # and cross-check them against each other and the reference.
    batch2 = 300
    x2 = jax.random.uniform(kx2, (batch2, N_QUBITS), dtype=jnp.float32)
    out_a = jax.block_until_ready(quantum_layer_forward(x2, weights))
    out_b = jax.block_until_ready(quantum_layer_forward(x2, weights, batch_tile=128))
    assert out_a.shape == (batch2, N_QUBITS)
    assert bool(jnp.all(jnp.isfinite(out_a)))
    assert np.allclose(np.asarray(out_a), np.asarray(out_b), atol=1e-6)
    ref2 = _reference_numpy(np.asarray(x2[:4]), np.asarray(weights), N_QUBITS)
    assert np.allclose(np.asarray(out_a[:4]), ref2, atol=1e-5)

    print("KERNEL_OK")
</pallas_src>

<mosaic_0001>
module attributes {stable_mosaic.version = 11 : i64} {
  func.func @quantum_layer_kernel(%arg0: i32, %arg1: memref<8x8xf32, #tpu.memory_space<vmem>>, %arg2: memref<8x1xf32, #tpu.memory_space<vmem>>, %arg3: memref<6x8xf32, #tpu.memory_space<vmem>>) attributes {dimension_semantics = [#tpu.dimension_semantics<parallel>], iteration_bounds = array<i64: 1>, scalar_prefetch = 0 : i64, scratch_operands = 0 : i64, tpu.core_type = #tpu.core_type<tc>, window_params = [{transform_indices = @transform_0, window_bounds = array<i64: 8, 8>}, {pipeline_mode = #tpu.pipeline_mode<synchronous>, transform_indices = @transform_1, window_bounds = array<i64: 8, 1>}, {transform_indices = @transform_2, window_bounds = array<i64: 6, 8>}]} {
    %c0 = arith.constant 0 : index
    %c0_0 = arith.constant 0 : index
    %0 = vector.load %arg2[%c0, %c0_0] : memref<8x1xf32, #tpu.memory_space<vmem>>, vector<8x1xf32>
    %c0_1 = arith.constant 0 : index
    %c0_2 = arith.constant 0 : index
    %1 = vector.load %arg1[%c0_1, %c0_2] : memref<8x8xf32, #tpu.memory_space<vmem>>, vector<8x8xf32>
    %cst = arith.constant 6.28318548 : f32
    %2 = vector.broadcast %cst : f32 to vector<8x8xf32>
    %3 = arith.mulf %1, %2 : vector<8x8xf32>
    %4 = math.cos %3 : vector<8x8xf32>
    %5 = vector.broadcast %0 : vector<8x1xf32> to vector<8x8xf32>
    %6 = arith.mulf %5, %4 : vector<8x8xf32>
    %7 = tpu.iota {dimensions = array<i32: 0>} : vector<8x8xi32>
    %c1_i32 = arith.constant 1 : i32
    %8 = tpu.dynamic_rotate %6 by %c1_i32 dim 0 : vector<8x8xf32>, i32 -> vector<8x8xf32>
    %c1_i32_3 = arith.constant 1 : i32
    %9 = vector.broadcast %c1_i32_3 : i32 to vector<8x8xi32>
    %10 = arith.cmpi sge, %7, %9 : vector<8x8xi32>
    %cst_4 = arith.constant 1.000000e+00 : f32
    %11 = vector.broadcast %cst_4 : f32 to vector<8x8xf32>
    %12 = arith.select %10, %8, %11 : vector<8x8xi1>, vector<8x8xf32>
    %13 = arith.mulf %6, %12 : vector<8x8xf32>
    %c2_i32 = arith.constant 2 : i32
    %14 = tpu.dynamic_rotate %13 by %c2_i32 dim 0 : vector<8x8xf32>, i32 -> vector<8x8xf32>
    %c2_i32_5 = arith.constant 2 : i32
    %15 = vector.broadcast %c2_i32_5 : i32 to vector<8x8xi32>
    %16 = arith.cmpi sge, %7, %15 : vector<8x8xi32>
    %cst_6 = arith.constant 1.000000e+00 : f32
    %17 = vector.broadcast %cst_6 : f32 to vector<8x8xf32>
    %18 = arith.select %16, %14, %17 : vector<8x8xi1>, vector<8x8xf32>
    %19 = arith.mulf %13, %18 : vector<8x8xf32>
    %c4_i32 = arith.constant 4 : i32
    %20 = tpu.dynamic_rotate %19 by %c4_i32 dim 0 : vector<8x8xf32>, i32 -> vector<8x8xf32>
    %c4_i32_7 = arith.constant 4 : i32
    %21 = vector.broadcast %c4_i32_7 : i32 to vector<8x8xi32>
    %22 = arith.cmpi sge, %7, %21 : vector<8x8xi32>
    %cst_8 = arith.constant 1.000000e+00 : f32
    %23 = vector.broadcast %cst_8 : f32 to vector<8x8xf32>
    %24 = arith.select %22, %20, %23 : vector<8x8xi1>, vector<8x8xf32>
    %25 = arith.mulf %19, %24 : vector<8x8xf32>
    %26 = vector.extract_strided_slice %6 {offsets = [1, 0], sizes = [1, 8], strides = [1, 1]} : vector<8x8xf32> to vector<1x8xf32>
    %27 = vector.extract_strided_slice %6 {offsets = [2, 0], sizes = [1, 8], strides = [1, 1]} : vector<8x8xf32> to vector<1x8xf32>
    %28 = arith.mulf %26, %27 : vector<1x8xf32>
    %29 = vector.extract_strided_slice %6 {offsets = [3, 0], sizes = [1, 8], strides = [1, 1]} : vector<8x8xf32> to vector<1x8xf32>
    %30 = arith.mulf %28, %29 : vector<1x8xf32>
    %31 = vector.extract_strided_slice %6 {offsets = [4, 0], sizes = [1, 8], strides = [1, 1]} : vector<8x8xf32> to vector<1x8xf32>
    %32 = arith.mulf %30, %31 : vector<1x8xf32>
    %33 = vector.extract_strided_slice %6 {offsets = [5, 0], sizes = [1, 8], strides = [1, 1]} : vector<8x8xf32> to vector<1x8xf32>
    %34 = arith.mulf %32, %33 : vector<1x8xf32>
    %c0_i32 = arith.constant 0 : i32
    %35 = vector.broadcast %c0_i32 : i32 to vector<8x8xi32>
    %36 = arith.cmpi eq, %7, %35 : vector<8x8xi32>
    %37 = vector.shape_cast %34 : vector<1x8xf32> to vector<1x8xf32>
    %38 = vector.broadcast %37 : vector<1x8xf32> to vector<8x8xf32>
    %39 = arith.select %36, %38, %25 : vector<8x8xi1>, vector<8x8xf32>
    %40 = vector.extract_strided_slice %39 {offsets = [0, 0], sizes = [6, 8], strides = [1, 1]} : vector<8x8xf32> to vector<6x8xf32>
    %cst_9 = arith.constant 1.000000e+00 : f32
    %41 = vector.broadcast %cst_9 : f32 to vector<6x8xf32>
    %42 = arith.subf %41, %40 : vector<6x8xf32>
    %cst_10 = arith.constant 5.000000e-01 : f32
    %43 = vector.broadcast %cst_10 : f32 to vector<6x8xf32>
    %44 = arith.mulf %43, %42 : vector<6x8xf32>
    %c0_11 = arith.constant 0 : index
    %c0_12 = arith.constant 0 : index
    %45 = vector.load %arg3[%c0_11, %c0_12] : memref<6x8xf32, #tpu.memory_space<vmem>>, vector<6x8xf32>
    tpu.vector_store %arg3[%c0_11, %c0_12], %44 {strides = array<i32>} : memref<6x8xf32, #tpu.memory_space<vmem>>, vector<6x8xf32>,
    return
  }
  func.func @transform_0(%arg0: i32) -> (i32, i32) {
    %c0_i32 = arith.constant 0 : i32
    %c0_i32_0 = arith.constant 0 : i32
    return %c0_i32, %arg0 : i32, i32
  }
  func.func @transform_1(%arg0: i32) -> (i32, i32) {
    %c0_i32 = arith.constant 0 : i32
    %c0_i32_0 = arith.constant 0 : i32
    %c0_i32_1 = arith.constant 0 : i32
    return %c0_i32, %c0_i32_0 : i32, i32
  }
  func.func @transform_2(%arg0: i32) -> (i32, i32) {
    %c0_i32 = arith.constant 0 : i32
    %c0_i32_0 = arith.constant 0 : i32
    return %c0_i32, %arg0 : i32, i32
  }
}

</mosaic_0001>

<bundles_post_ra>
// kernel: quantum_layer_forward.1
= control target key start
LH: loop header
LB: loop body
LE: loop exit
PB: predicated region body
PF: predicated region fallthrough
CT: control target
= control target key end

     0   :  { %v184_v0 = vmov 0   ;;  %v185_v15 = vmov 683565275   ;;  %v186_v17 = vmov 2475754826   ;;  %s236_s1 = inlined_call_operand.vmem [shape: f32[8,1], index: 1, kind: input, shape index: {}]   ;;  %s237_s0 = inlined_call_operand.vmem [shape: f32[8,8], index: 0, kind: input, shape index: {}]   ;;  %s238_s2 = inlined_call_operand.vmem [shape: f32[6,8], index: 2, kind: output, shape index: {}]  }
   0x1   :  { %179 = vset.pattern.permute.xlu0 %v184_v0  ;;  %v11_v1 = vld [vmem:[%s236_s1] sm:$0xff]  ;;  %v187_v19 = vmov 2131351028   ;;  %v188_v21 = vmov 2102212464  }
   0x2   :  { %119 = vperm.xlu0 %179, %v11_v1   ;;  %v12_v2 = vld [vmem:[%s237_s0] sm:$0xff]  ;;  %v189_v23 = vmov 920167782   ;;  %v190_v30 = vmov 1326507024  }
   0x3   :  { %v212_v3 = vmul.f32 6.2831855, %v12_v2 }
   0x5   :  { %v17_v4 = vand.u32 2139095040, %v212_v3  ;;  %v14_v6 = vand.u32 2147483647, %v212_v3  ;;  %vm16_vm7 = vcmp.lt.s32.totalorder %v212_v3, 0  ;;  %vm106_vm12 = vweird.f32 %v212_v3 }
   0x7   :  { %v18_v5 = vshrl.u32 %v17_v4, 23  ;;  %v21_v9 = vand.u32 8388607, %v14_v6  ;;  %vm15_vm8 = vcmp.le.f32.partialorder %v14_v6, 0.7853982 }
   0x9   :  { %v164_v7 = vadd.s32 4294967169, %v18_v5  ;;  %v22_v12 = vor.u32 8388608, %v21_v9 }
   0xb   :  { %v24_v8 = vadd.s32 1, %v164_v7  ;;  %v62_v32 = vshll.u32 %v22_v12, 8 }
   0xd   :  { %vm25_vm0 = vcmp.gt.s32.totalorder %v24_v8, 0 }
   0xe   :  { %v26_v10 = vsel %vm25_vm0, %v24_v8, 0 }
   0xf   :  { %v28_v11 = vand.u32 31, %v26_v10  ;;  %v27_v13 = vshrl.u32 %v26_v10, 5 }
  0x11   :  { %v29_v14 = vsub.s32 32, %v28_v11  ;;  %v31_v16 = vshll.u32 %v185_v15, %v28_v11  ;;  %v34_v18 = vshll.u32 %v186_v17, %v28_v11  ;;  %v37_v20 = vshll.u32 %v187_v19, %v28_v11 }
  0x12   :  { %v40_v22 = vshll.u32 %v188_v21, %v28_v11  ;;  %v43_v24 = vshll.u32 %v189_v23, %v28_v11  ;;  %vm46_vm1 = vcmp.lt.s32.totalorder %v27_v13, 1  ;;  %vm49_vm2 = vcmp.lt.s32.totalorder %v27_v13, 4 }
  0x13   :  { %v30_v25 = vshrl.u32 %v185_v15, %v29_v14  ;;  %v32_v26 = vshrl.u32 %v186_v17, %v29_v14  ;;  %v35_v27 = vshrl.u32 %v187_v19, %v29_v14  ;;  %v38_v28 = vshrl.u32 %v188_v21, %v29_v14 }
  0x14   :  { %v41_v29 = vshrl.u32 %v189_v23, %v29_v14  ;;  %v44_v31 = vshrl.u32 %v190_v30, %v29_v14  ;;  %vm47_vm3 = vcmp.lt.s32.totalorder %v27_v13, 2  ;;  %vm48_vm4 = vcmp.lt.s32.totalorder %v27_v13, 3 }
  0x15   :  { %v33_v33 = vor.u32 %v32_v26, %v31_v16  ;;  %v36_v34 = vor.u32 %v35_v27, %v34_v18  ;;  %v39_v35 = vor.u32 %v38_v28, %v37_v20  ;;  %v123_v30 = vlaneseq }
  0x16   :  { %v42_v36 = vor.u32 %v41_v29, %v40_v22  ;;  %v45_v37 = vor.u32 %v44_v31, %v43_v24 }
  0x17   :  { %v50_v38 = vsel %vm46_vm1, %v30_v25, %v33_v33  ;;  %v51_v39 = vsel %vm49_vm2, %v39_v35, 2102212464  ;;  %v54_v40 = vsel %vm46_vm1, %v33_v33, %v36_v34  ;;  %v58_v41 = vsel %vm46_vm1, %v36_v34, %v39_v35 }
  0x18   :  { %v52_v42 = vsel %vm48_vm4, %v36_v34, %v51_v39  ;;  %v55_v43 = vsel %vm49_vm2, %v42_v36, 920167782  ;;  %v59_v44 = vsel %vm49_vm2, %v45_v37, 1326507024  ;;  %v124_v31 = vshrl.u32 %v123_v30, 7 }
  0x19   :  { %v56_v45 = vsel %vm48_vm4, %v39_v35, %v55_v43  ;;  %v60_v46 = vsel %vm48_vm4, %v42_v36, %v59_v44  ;;  %v53_v47 = vsel %vm47_vm3, %v50_v38, %v52_v42  ;;  %vm158_vm1 = vcmask 62464  }
  0x1a   :  { %v57_v48 = vsel %vm47_vm3, %v54_v40, %v56_v45  ;;  %v61_v49 = vsel %vm47_vm3, %v58_v41, %v60_v46  ;;  %v69_v54 = vmul.u32 %v62_v32, %v53_v47  ;;  %vm126_vm13 = vcmp.ge.s32.totalorder %v124_v31, 1 }
  0x1b   :  { %v218_v50 = vmul.u32.u64.low %v62_v32, %v61_v49  ;;  %v219_v51 = vmul.u32.u64.high %v62_v32, %v61_v49, %v218_v50  ;;  %v221_v52 = vmul.u32.u64.low %v62_v32, %v57_v48  ;;  %v222_v53 = vmul.u32.u64.high %v62_v32, %v57_v48, %v221_v52 }
  0x1c   :  { %vm130_vm14 = vcmp.ge.s32.totalorder %v124_v31, 2  ;;  %vm134_vm15 = vcmp.ge.s32.totalorder %v124_v31, 4  ;;  %v153_v47 = vsub.s32 1, %v124_v31  ;;  %vm150_vm0 = vcmp.eq.s32.totalorder %v124_v31, 0 }
  0x1d   :  { %vm71_vm5 = vc.u32 %v219_v51, %v221_v52  ;;  %v72_v55 = vadd.s32 1, %v222_v53  ;;  %v70_v5 = vadd.s32 %v221_v52, %v219_v51 }
  0x1f   :  { %v73_v56 = vsel %vm71_vm5, %v72_v55, %v222_v53 }
  0x20   :  { %v74_v57 = vadd.s32 %v73_v56, %v69_v54 }
  0x22   :  { %v75_v58 = vadd.s32 536870912, %v74_v57 }
  0x24   :  { %v76_v59 = vshrl.u32 %v75_v58, 30 }
  0x26   :  { %v77_v60 = vshll.u32 %v76_v59, 30  ;;  %v100_v20 = vsub.s32 4, %v76_v59 }
  0x28   :  { %v78_v61 = vsub.s32 %v74_v57, %v77_v60  ;;  %v101_v21 = vsel %vm16_vm7, %v100_v20, %v76_v59 }
  0x29   :  { %v103_v22 = vsel %vm15_vm8, 0, %v101_v21 }
  0x2a   :  { %v80_v62 = vsub.s32 0, %v78_v61  ;;  %v107_v25 = vand.u32 3, %v103_v22 }
  0x2c   :  { %v165_v63 = vmin.u32 %v80_v62, %v78_v61  ;;  %vm109_vm9 = vcmp.eq.s32.totalorder %v107_v25, 0  ;;  %vm112_vm10 = vcmp.eq.s32.totalorder %v107_v25, 2  ;;  %vm108_vm11 = vcmp.lt.s32.totalorder %v107_v25, 2 }
  0x2e   :  { %v82_v0 = vclz %v165_v63 }
  0x30   :  { %v166_v1 = vadd.s32 4294967294, %v82_v0 }
  0x32   :  { %vm167_vm6 = vcmp.lt.s32.totalorder %v166_v1, 0 }
  0x33   :  { %v85_v2 = vsel %vm167_vm6, 0, %v166_v1 }
  0x34   :  { %v90_v4 = vsub.s32 4294967266, %v85_v2  ;;  %v86_v7 = vsub.s32 32, %v85_v2  ;;  %v87_v9 = vshll.u32 %v78_v61, %v85_v2 }
  0x36   :  { %v91_v8 = vadd.s32 127, %v90_v4  ;;  %v88_v10 = vshrl.u32 %v70_v5, %v86_v7 }
  0x38   :  { %v92_v11 = vshll.u32 %v91_v8, 23  ;;  %v89_v12 = vor.u32 %v88_v10, %v87_v9 }
  0x3a   :  { %v93_v13 = vor.u32 4788187, %v92_v11  ;;  %v96_v15 = vcvt.s32.f32 %v89_v12 }
  0x3c   :  { %v94_v14 = vand.u32 2147483647, %v93_v13 }
  0x3e   :  { %v97_v16 = vmul.f32 %v96_v15, %v94_v14 }
  0x40   :  { %v98_v17 = vxor.u32 2147483648, %v97_v16 }
  0x42   :  { %v99_v18 = vsel %vm16_vm7, %v98_v17, %v97_v16 }
  0x43   :  { %v102_v19 = vsel %vm15_vm8, %v212_v3, %v99_v18 }
  0x44   :  { %180 = vcosq.f32 %v102_v19 }
  0x45   :  { %182 = vsinq.f32 %v102_v19 }
  0x51   :  { %v181_v23 = vpop.eup %180 }
  0x52   :  { %v183_v24 = vpop.eup %182  ;;  %v113_v27 = vxor.u32 2147483648, %v181_v23 }
  0x53   :  { %v110_v26 = vxor.u32 2147483648, %v183_v24 }
  0x54   :  { %v114_v29 = vsel %vm112_vm10, %v113_v27, %v183_v24 }
  0x55   :  { %v111_v28 = vsel %vm109_vm9, %v181_v23, %v110_v26 }
  0x56   :  { %v115_v6 = vsel %vm108_vm11, %v111_v28, %v114_v29 }
  0x57   :  { %v116_v32 = vsel %vm106_vm12, nan, %v115_v6 }
  0x7d   :  { %v120_v33 = vpop.permute.xlu0 %119 }
  0x7e   :  { %v122_v34 = vmul.f32 %v120_v33, %v116_v32 }
  0x80   :  { %v125_v35 = vrot.slane %v122_v34, 7  ;;  %v138_v36 = vrot.slane %v122_v34, 1  ;;  %v141_v39 = vrot.slane %v122_v34, 2  ;;  %v144_v42 = vrot.slane %v122_v34, 3 }
  0x81   :  { %v147_v46 = vrot.slane %v122_v34, 4 }
  0x82   :  { %v127_v37 = vsel %vm126_vm13, %v125_v35, 1.0  ;;  %v140_v38 = vmul.f32 %v138_v36, %v122_v34 }
  0x83   :  { %v128_v40 = vmul.f32 %v127_v37, %v122_v34 }
  0x84   :  { %v143_v41 = vmul.f32 %v141_v39, %v140_v38 }
  0x85   :  { %v129_v43 = vrot.slane %v128_v40, 6 }
  0x86   :  { %v146_v44 = vmul.f32 %v144_v42, %v143_v41 }
  0x87   :  { %v131_v45 = vsel %vm130_vm14, %v129_v43, 1.0 }
  0x88   :  { %v132_v3 = vmul.f32 %v131_v45, %v128_v40  ;;  %v149_v48 = vmul.f32 %v147_v46, %v146_v44 }
  0x8a   :  { %v133_v49 = vrot.slane %v132_v3, 4  ;;  %v154_v52 = vrot.slane %v149_v48, %v153_v47 }
  0x8c   :  { %v135_v50 = vsel %vm134_vm15, %v133_v49, 1.0 }
  0x8d   :  { %v136_v51 = vmul.f32 %v135_v50, %v132_v3 }
  0x8f   :  { %v155_v53 = vsel %vm150_vm0, %v154_v52, %v136_v51 }
  0x90   :  { %v156_v54 = vsub.f32 1.0, %v155_v53 }
  0x92   :  { %v157_v55 = vmul.f32 0.5, %v156_v54 }
  0x94   :  { %159 = vst.msk [vmem:[%s238_s2] sm:$0x3f] %vm158_vm1, %v157_v55 }

</bundles_post_ra>
